<compile_context>
chip_gen: v7x
topology: tpu7x:2x2x1
jax: 0.10.0
libtpu: 0.0.40
codegen_flags: <defaults>
</compile_context>

<pallas_src>
import numpy as np
import jax
import jax.numpy as jnp
from jax.experimental import pallas as pl
from jax.experimental.pallas import tpu as pltpu


def _round_up(x, m):
    return ((x + m - 1) // m) * m


def make_tt_kernel(F, P, R, TB):
    def kernel(xt_ref, w_ref, out_ref):
        # xt_ref : (F*P, TB), batch on lanes
        # w_ref  : (F, R, R*P), scale-folded packed cores (resident in VMEM)
        # out_ref: (R, TB) f32
        dt = w_ref.dtype
        v0 = xt_ref[0:P, :]                                    # (P, TB)
        w0 = w_ref[0][:, 0:P]                                  # (R, P)  feature-0 block
        result = jnp.dot(w0, v0.astype(dt),
                         preferred_element_type=jnp.float32)   # (R, TB) f32
        for i in range(1, F):
            vi = xt_ref[i * P:(i + 1) * P, :]                  # (P, TB)
            # z[a*P + p, b] = result[a, b] * vi[p, b]; both operands are reshaped
            # broadcasts (no computed 3-D product is relayouted), multiply stays 2-D.
            rep = jnp.broadcast_to(result[:, None, :], (R, P, TB)).reshape(R * P, TB)
            til = jnp.broadcast_to(vi[None, :, :], (R, P, TB)).reshape(R * P, TB)
            z = rep.astype(dt) * til.astype(dt)                # (R*P, TB), lane-dense
            result = jnp.dot(w_ref[i], z,
                             preferred_element_type=jnp.float32)  # (R, TB) f32
        out_ref[...] = result
    return kernel


def pack_tt_cores(cores, cf_m2, cf_res, *, F, P, R, O, dtype=jnp.float32):
    """Fold every scalar correction factor into the TT cores and pack to (F, R, R*P).

    W[i][d, a*P + p] = core_i[a, p, d] * scale_i. Feature 0 only uses the first P
    columns; the last feature's r_out=O rows are zero-padded to R (sliced off later).
    """
    inv_sp = 1.0 / np.sqrt(P)
    inv_sr = 1.0 / np.sqrt(R)
    W = jnp.zeros((F, R, R * P), dtype=jnp.float32)
    w0 = jnp.transpose(cores[0][0], (1, 0)) * (inv_sp * cf_m2[0])
    W = W.at[0, :, :P].set(w0.astype(jnp.float32))
    for i in range(1, F):
        r_out = O if i == F - 1 else R
        s = inv_sp * cf_m2[i] * inv_sr * cf_res[i - 1]
        wi = jnp.transpose(cores[i], (2, 0, 1)).reshape(r_out, R * P) * s
        W = W.at[i, :r_out, :].set(wi.astype(jnp.float32))
    return W.astype(dtype)   # scales folded in f32; optional bf16 cast (v5e MXU)


def choose_batch_tile(B, tb_max=8192):
    """Pick a lane-aligned batch tile; prefer >= 2 grid steps so v7x megacore can
    shard the ("parallel",) batch axis across its two TensorCores."""
    assert tb_max % 128 == 0
    Bp128 = _round_up(B, 128)
    if Bp128 < 256:
        TB = Bp128                            # tiny batch: one tile
    elif Bp128 <= tb_max:
        TB = _round_up(Bp128 // 2, 128)       # split into >= 2 tiles
    else:
        TB = tb_max
    Bp = _round_up(B, TB)
    return TB, Bp


def prepare_activations(vec_input, *, TB, dtype=jnp.float32):
    """(B, F*P) -> zero-padded, transposed (F*P, Bp) with the batch on lanes.

    When forward() is called repeatedly on the same data (training loop / CV folds),
    call this ONCE and reuse the result with tt_forward_prepped() to avoid an extra
    HBM transpose+pad pass per call.
    """
    B, FP = vec_input.shape
    Bp = _round_up(B, TB)
    return jnp.zeros((FP, Bp), dtype).at[:, :B].set(vec_input.astype(dtype).T)


def tt_forward_prepped(xt, W, *, B, F, P, R, O, TB):
    """Run the TT chain on already-prepped activations xt: (F*P, Bp) -> (B, O)."""
    FP, Bp = xt.shape
    assert FP == F * P and Bp % TB == 0 and TB % 128 == 0

    # Generous per-lane-column VMEM budget: double-buffered in/out pipeline blocks plus
    # the z slabs / broadcast operands of the unrolled chain; capped for v7x (64 MiB/TC).
    cols = 2 * (F * P + R) + (F + 2) * (R * P) + 4 * R
    vmem_bytes = 4 * cols * TB + 4 * F * R * R * P + (4 << 20)
    vmem_bytes = int(min(max(vmem_bytes, 16 << 20), 48 << 20))

    kernel = make_tt_kernel(F, P, R, TB)
    out_t = pl.pallas_call(
        kernel,
        out_shape=jax.ShapeDtypeStruct((R, Bp), jnp.float32),
        grid=(Bp // TB,),
        in_specs=[
            pl.BlockSpec((F * P, TB), lambda b: (0, b)),           # activation batch tile
            pl.BlockSpec(memory_space=pltpu.MemorySpace.VMEM),     # packed cores, resident
        ],
        out_specs=pl.BlockSpec((R, TB), lambda b: (0, b)),
        compiler_params=pltpu.CompilerParams(
            dimension_semantics=("parallel",),
            vmem_limit_bytes=vmem_bytes),
    )(xt, W)
    return out_t[:O, :B].T                                         # (B, O)


def tt_forward_pallas(vec_input, cores, cf_m2, cf_res, *, F, P, R, O,
                      tb_max=8192, compute_dtype=jnp.float32):
    """Net.forward: vec_input (B, F*P) -> (B, O). Convenience wrapper (packs W,
    preps activations, runs the kernel). Use the prepped path directly in hot loops."""
    B = vec_input.shape[0]
    TB, _ = choose_batch_tile(B, tb_max)
    W = pack_tt_cores(cores, cf_m2, cf_res, F=F, P=P, R=R, O=O, dtype=compute_dtype)
    xt = prepare_activations(vec_input, TB=TB, dtype=compute_dtype)
    return tt_forward_prepped(xt, W, B=B, F=F, P=P, R=R, O=O, TB=TB)


if __name__ == "__main__":
    # small, forward-consistent shapes
    B, F, P, R, O = 16, 6, 8, 8, 1   # batch, num_features, poly_order, rank, num_output

    key = jax.random.PRNGKey(0)
    keys = jax.random.split(key, F + 1)
    x = jax.random.normal(keys[0], (B, F * P), dtype=jnp.float32)

    # TT-core init matching __init__: normal(0, 1) * 1/sqrt(poly_order)
    cores = []
    for i in range(F):
        r_in = 1 if i == 0 else R
        r_out = O if i == F - 1 else R
        g = jax.random.normal(keys[i + 1], (r_in, P, r_out), dtype=jnp.float32) / np.sqrt(P)
        cores.append(g)

    # correction factors (mirrors Net.get_correction_factor; torch.std is unbiased -> ddof=1)
    # TODO(synk): correction_factor (first ctor arg) is never used in forward(), so it is omitted.
    cf_m2_list, cf_res_list, mode2 = [], [], []
    for i in range(F):
        v = x[:, i * P:(i + 1) * P]
        Gi = jnp.einsum('abc,db->dac', cores[i], v) / np.sqrt(P)
        s = jnp.std(Gi, ddof=1)
        cf_m2_list.append(1.0 / s)
        mode2.append(Gi / s)
    res = mode2[0].reshape(B, R)
    for i in range(F - 1):
        rb = jnp.einsum('ab,abd->ad', res, mode2[i + 1]) / np.sqrt(R)
        s = jnp.std(rb, ddof=1)
        cf_res_list.append(1.0 / s)
        res = rb / s
    cf_m2 = jnp.stack(cf_m2_list).astype(jnp.float32)     # (F,)
    cf_res = jnp.stack(cf_res_list).astype(jnp.float32)   # (F-1,)

    out = tt_forward_pallas(x, cores, cf_m2, cf_res, F=F, P=P, R=R, O=O)
    out = jax.block_until_ready(out)

    # plain-JAX reference of Net.forward for verification
    ref_mode2 = []
    for i in range(F):
        v = x[:, i * P:(i + 1) * P]
        ref_mode2.append(jnp.einsum('abc,db->dac', cores[i], v) / np.sqrt(P) * cf_m2[i])
    ref = ref_mode2[0].reshape(B, R)
    for i in range(F - 1):
        ref = jnp.einsum('ab,abd->ad', ref, ref_mode2[i + 1]) / np.sqrt(R) * cf_res[i]

    assert out.shape == (B, O)
    if not np.allclose(np.asarray(out), np.asarray(ref), rtol=1e-3, atol=1e-4):
        raise AssertionError("Pallas kernel output does not match reference forward pass")
    print("KERNEL_OK")
</pallas_src>

<mosaic_0001>
module attributes {stable_mosaic.version = 11 : i64} {
  func.func @kernel(%arg0: i32, %arg1: memref<48x128xf32, #tpu.memory_space<vmem>>, %arg2: memref<6x8x64xf32, #tpu.memory_space<vmem>>, %arg3: memref<8x128xf32, #tpu.memory_space<vmem>>) attributes {dimension_semantics = [#tpu.dimension_semantics<parallel>], iteration_bounds = array<i64: 1>, scalar_prefetch = 0 : i64, scratch_operands = 0 : i64, tpu.core_type = #tpu.core_type<tc>, window_params = [{transform_indices = @transform_0, window_bounds = array<i64: 48, 128>}, {pipeline_mode = #tpu.pipeline_mode<synchronous>, transform_indices = @transform_1, window_bounds = array<i64: 6, 8, 64>}, {transform_indices = @transform_2, window_bounds = array<i64: 8, 128>}]} {
    %c0 = arith.constant 0 : index
    %c0_0 = arith.constant 0 : index
    %0 = vector.load %arg1[%c0, %c0_0] : memref<48x128xf32, #tpu.memory_space<vmem>>, vector<8x128xf32>
    %c0_1 = arith.constant 0 : index
    %c0_2 = arith.constant 0 : index
    %c0_3 = arith.constant 0 : index
    %1 = vector.load %arg2[%c0_1, %c0_2, %c0_3] : memref<6x8x64xf32, #tpu.memory_space<vmem>>, vector<1x8x64xf32>
    %2 = vector.shape_cast %1 : vector<1x8x64xf32> to vector<8x64xf32>
    %3 = vector.extract_strided_slice %2 {offsets = [0, 0], sizes = [8, 8], strides = [1, 1]} : vector<8x64xf32> to vector<8x8xf32>
    %cst = arith.constant dense<0.000000e+00> : vector<8x128xf32>
    %4 = tpu.matmul %3, %0, %cst {dimension_numbers = #tpu.dot_dimension_numbers<[1], [0], [0], [1], [0, 0, 1, 1], [], []>} : vector<8x8xf32>, vector<8x128xf32>, vector<8x128xf32> -> vector<8x128xf32>
    %c8 = arith.constant 8 : index
    %c0_4 = arith.constant 0 : index
    %5 = vector.load %arg1[%c8, %c0_4] : memref<48x128xf32, #tpu.memory_space<vmem>>, vector<8x128xf32>
    %6 = vector.shape_cast %4 : vector<8x128xf32> to vector<8x1x128xf32>
    %7 = vector.shape_cast %6 : vector<8x1x128xf32> to vector<8x1x128xf32>
    %8 = vector.broadcast %7 : vector<8x1x128xf32> to vector<8x8x128xf32>
    %9 = vector.shape_cast %8 : vector<8x8x128xf32> to vector<64x128xf32>
    %10 = vector.shape_cast %5 : vector<8x128xf32> to vector<1x8x128xf32>
    %11 = vector.shape_cast %10 : vector<1x8x128xf32> to vector<1x8x128xf32>
    %12 = vector.broadcast %11 : vector<1x8x128xf32> to vector<8x8x128xf32>
    %13 = vector.shape_cast %12 : vector<8x8x128xf32> to vector<64x128xf32>
    %14 = arith.mulf %9, %13 : vector<64x128xf32>
    %c1 = arith.constant 1 : index
    %c0_5 = arith.constant 0 : index
    %c0_6 = arith.constant 0 : index
    %15 = vector.load %arg2[%c1, %c0_5, %c0_6] : memref<6x8x64xf32, #tpu.memory_space<vmem>>, vector<1x8x64xf32>
    %16 = vector.shape_cast %15 : vector<1x8x64xf32> to vector<8x64xf32>
    %cst_7 = arith.constant dense<0.000000e+00> : vector<8x128xf32>
    %17 = tpu.matmul %16, %14, %cst_7 {dimension_numbers = #tpu.dot_dimension_numbers<[1], [0], [0], [1], [0, 0, 1, 1], [], []>} : vector<8x64xf32>, vector<64x128xf32>, vector<8x128xf32> -> vector<8x128xf32>
    %c16 = arith.constant 16 : index
    %c0_8 = arith.constant 0 : index
    %18 = vector.load %arg1[%c16, %c0_8] : memref<48x128xf32, #tpu.memory_space<vmem>>, vector<8x128xf32>
    %19 = vector.shape_cast %17 : vector<8x128xf32> to vector<8x1x128xf32>
    %20 = vector.shape_cast %19 : vector<8x1x128xf32> to vector<8x1x128xf32>
    %21 = vector.broadcast %20 : vector<8x1x128xf32> to vector<8x8x128xf32>
    %22 = vector.shape_cast %21 : vector<8x8x128xf32> to vector<64x128xf32>
    %23 = vector.shape_cast %18 : vector<8x128xf32> to vector<1x8x128xf32>
    %24 = vector.shape_cast %23 : vector<1x8x128xf32> to vector<1x8x128xf32>
    %25 = vector.broadcast %24 : vector<1x8x128xf32> to vector<8x8x128xf32>
    %26 = vector.shape_cast %25 : vector<8x8x128xf32> to vector<64x128xf32>
    %27 = arith.mulf %22, %26 : vector<64x128xf32>
    %c2 = arith.constant 2 : index
    %c0_9 = arith.constant 0 : index
    %c0_10 = arith.constant 0 : index
    %28 = vector.load %arg2[%c2, %c0_9, %c0_10] : memref<6x8x64xf32, #tpu.memory_space<vmem>>, vector<1x8x64xf32>
    %29 = vector.shape_cast %28 : vector<1x8x64xf32> to vector<8x64xf32>
    %cst_11 = arith.constant dense<0.000000e+00> : vector<8x128xf32>
    %30 = tpu.matmul %29, %27, %cst_11 {dimension_numbers = #tpu.dot_dimension_numbers<[1], [0], [0], [1], [0, 0, 1, 1], [], []>} : vector<8x64xf32>, vector<64x128xf32>, vector<8x128xf32> -> vector<8x128xf32>
    %c24 = arith.constant 24 : index
    %c0_12 = arith.constant 0 : index
    %31 = vector.load %arg1[%c24, %c0_12] : memref<48x128xf32, #tpu.memory_space<vmem>>, vector<8x128xf32>
    %32 = vector.shape_cast %30 : vector<8x128xf32> to vector<8x1x128xf32>
    %33 = vector.shape_cast %32 : vector<8x1x128xf32> to vector<8x1x128xf32>
    %34 = vector.broadcast %33 : vector<8x1x128xf32> to vector<8x8x128xf32>
    %35 = vector.shape_cast %34 : vector<8x8x128xf32> to vector<64x128xf32>
    %36 = vector.shape_cast %31 : vector<8x128xf32> to vector<1x8x128xf32>
    %37 = vector.shape_cast %36 : vector<1x8x128xf32> to vector<1x8x128xf32>
    %38 = vector.broadcast %37 : vector<1x8x128xf32> to vector<8x8x128xf32>
    %39 = vector.shape_cast %38 : vector<8x8x128xf32> to vector<64x128xf32>
    %40 = arith.mulf %35, %39 : vector<64x128xf32>
    %c3 = arith.constant 3 : index
    %c0_13 = arith.constant 0 : index
    %c0_14 = arith.constant 0 : index
    %41 = vector.load %arg2[%c3, %c0_13, %c0_14] : memref<6x8x64xf32, #tpu.memory_space<vmem>>, vector<1x8x64xf32>
    %42 = vector.shape_cast %41 : vector<1x8x64xf32> to vector<8x64xf32>
    %cst_15 = arith.constant dense<0.000000e+00> : vector<8x128xf32>
    %43 = tpu.matmul %42, %40, %cst_15 {dimension_numbers = #tpu.dot_dimension_numbers<[1], [0], [0], [1], [0, 0, 1, 1], [], []>} : vector<8x64xf32>, vector<64x128xf32>, vector<8x128xf32> -> vector<8x128xf32>
    %c32 = arith.constant 32 : index
    %c0_16 = arith.constant 0 : index
    %44 = vector.load %arg1[%c32, %c0_16] : memref<48x128xf32, #tpu.memory_space<vmem>>, vector<8x128xf32>
    %45 = vector.shape_cast %43 : vector<8x128xf32> to vector<8x1x128xf32>
    %46 = vector.shape_cast %45 : vector<8x1x128xf32> to vector<8x1x128xf32>
    %47 = vector.broadcast %46 : vector<8x1x128xf32> to vector<8x8x128xf32>
    %48 = vector.shape_cast %47 : vector<8x8x128xf32> to vector<64x128xf32>
    %49 = vector.shape_cast %44 : vector<8x128xf32> to vector<1x8x128xf32>
    %50 = vector.shape_cast %49 : vector<1x8x128xf32> to vector<1x8x128xf32>
    %51 = vector.broadcast %50 : vector<1x8x128xf32> to vector<8x8x128xf32>
    %52 = vector.shape_cast %51 : vector<8x8x128xf32> to vector<64x128xf32>
    %53 = arith.mulf %48, %52 : vector<64x128xf32>
    %c4 = arith.constant 4 : index
    %c0_17 = arith.constant 0 : index
    %c0_18 = arith.constant 0 : index
    %54 = vector.load %arg2[%c4, %c0_17, %c0_18] : memref<6x8x64xf32, #tpu.memory_space<vmem>>, vector<1x8x64xf32>
    %55 = vector.shape_cast %54 : vector<1x8x64xf32> to vector<8x64xf32>
    %cst_19 = arith.constant dense<0.000000e+00> : vector<8x128xf32>
    %56 = tpu.matmul %55, %53, %cst_19 {dimension_numbers = #tpu.dot_dimension_numbers<[1], [0], [0], [1], [0, 0, 1, 1], [], []>} : vector<8x64xf32>, vector<64x128xf32>, vector<8x128xf32> -> vector<8x128xf32>
    %c40 = arith.constant 40 : index
    %c0_20 = arith.constant 0 : index
    %57 = vector.load %arg1[%c40, %c0_20] : memref<48x128xf32, #tpu.memory_space<vmem>>, vector<8x128xf32>
    %58 = vector.shape_cast %56 : vector<8x128xf32> to vector<8x1x128xf32>
    %59 = vector.shape_cast %58 : vector<8x1x128xf32> to vector<8x1x128xf32>
    %60 = vector.broadcast %59 : vector<8x1x128xf32> to vector<8x8x128xf32>
    %61 = vector.shape_cast %60 : vector<8x8x128xf32> to vector<64x128xf32>
    %62 = vector.shape_cast %57 : vector<8x128xf32> to vector<1x8x128xf32>
    %63 = vector.shape_cast %62 : vector<1x8x128xf32> to vector<1x8x128xf32>
    %64 = vector.broadcast %63 : vector<1x8x128xf32> to vector<8x8x128xf32>
    %65 = vector.shape_cast %64 : vector<8x8x128xf32> to vector<64x128xf32>
    %66 = arith.mulf %61, %65 : vector<64x128xf32>
    %c5 = arith.constant 5 : index
    %c0_21 = arith.constant 0 : index
    %c0_22 = arith.constant 0 : index
    %67 = vector.load %arg2[%c5, %c0_21, %c0_22] : memref<6x8x64xf32, #tpu.memory_space<vmem>>, vector<1x8x64xf32>
    %68 = vector.shape_cast %67 : vector<1x8x64xf32> to vector<8x64xf32>
    %cst_23 = arith.constant dense<0.000000e+00> : vector<8x128xf32>
    %69 = tpu.matmul %68, %66, %cst_23 {dimension_numbers = #tpu.dot_dimension_numbers<[1], [0], [0], [1], [0, 0, 1, 1], [], []>} : vector<8x64xf32>, vector<64x128xf32>, vector<8x128xf32> -> vector<8x128xf32>
    %c0_24 = arith.constant 0 : index
    %c0_25 = arith.constant 0 : index
    %70 = vector.load %arg3[%c0_24, %c0_25] : memref<8x128xf32, #tpu.memory_space<vmem>>, vector<8x128xf32>
    tpu.vector_store %arg3[%c0_24, %c0_25], %69 {strides = array<i32>} : memref<8x128xf32, #tpu.memory_space<vmem>>, vector<8x128xf32>,
    return
  }
  func.func @transform_0(%arg0: i32) -> (i32, i32) {
    %c0_i32 = arith.constant 0 : i32
    %c0_i32_0 = arith.constant 0 : i32
    return %c0_i32, %arg0 : i32, i32
  }
  func.func @transform_1(%arg0: i32) -> (i32, i32, i32) {
    %c0_i32 = arith.constant 0 : i32
    %c0_i32_0 = arith.constant 0 : i32
    %c0_i32_1 = arith.constant 0 : i32
    %c0_i32_2 = arith.constant 0 : i32
    return %c0_i32, %c0_i32_0, %c0_i32_1 : i32, i32, i32
  }
  func.func @transform_2(%arg0: i32) -> (i32, i32) {
    %c0_i32 = arith.constant 0 : i32
    %c0_i32_0 = arith.constant 0 : i32
    return %c0_i32, %arg0 : i32, i32
  }
}

</mosaic_0001>

<bundles_post_ra>
// kernel: tpu_custom_call.1
= control target key start
LH: loop header
LB: loop body
LE: loop exit
PB: predicated region body
PF: predicated region fallthrough
CT: control target
= control target key end

     0   :  { %7 = vsyncpa [#allocation3], 0  ;;  %s1470_s0 = inlined_call_operand.hbm [shape: f32[48,128], index: 0, kind: input, shape index: {}]   ;;  %s1471_s1 = inlined_call_operand.hbm [shape: f32[6,8,64], index: 1, kind: input, shape index: {}]   ;;  %s1472_s2 = inlined_call_operand.hbm [shape: f32[8,128], index: 2, kind: output, shape index: {}]  }
   0x1   :  { %8 = vsyncpa [#allocation6], 0 }
   0x2   :  { %9 = vsyncpa [#allocation4], 0  ;;  %s1298_s9 = smov [#allocation2]   ;;  %s1226_s13 = scalar_lea.hbm %s1470_s0, 768 }
   0x3   :  { %s15_s10 = sshll.u32 %s1298_s9, 4  ;;  %p1227_p0 = scmp.ne.s32.totalorder %s1470_s0, %s1226_s13  ;;  %s16_s10 = int_to_ptr.vmem [resolvable:$true] %s15_s10 }
   0x4   :  { %p1230_p1 = scmp.lt.u32.totalorder %s1226_s13, %s1470_s0 }
   0x6   :  { %p1232_p2 = pnand %p1230_p1, %p1227_p0 }
   0x8   :  { %1235 = shalt.err (!%p1232_p2)
}
   0x9   :  { %s1236_s18 = scalar_lea.vmem %s16_s10, 768  ;;  %p1241_p4 = scmp.lt.s32.totalorder %s16_s10, %s16_s10 }
   0xa   :  { %p1237_p3 = scmp.ne.s32.totalorder %s16_s10, %s1236_s18  ;;  %p1242_p5 = scmp.lt.s32.totalorder %s1236_s18, %s1236_s18 }
   0xc   :  { %p1243_p6 = por %p1242_p5, %p1241_p4 }
   0xe   :  { %p1244_p7 = pnand %p1243_p6, %p1237_p3 }
  0x10   :  { %1247 = shalt.err (!%p1244_p7)
}
  0x11   :  { %s1299_s19 = smov 128   ;;  %s1300_s20 = smov 8  }
  0x12   :  { %21 = dma.hbm_to_vmem [thread:$0]  %s1470_s0, 768, %s16_s10, [#allocation3], %s1299_s19, %s1299_s19, %s1300_s20  }
  0x13   :  { %s1301_s23 = smov [#allocation5]   ;;  %s1248_s27 = scalar_lea.hbm %s1471_s1, 768 }
  0x14   :  { %s27_s24 = sshll.u32 %s1301_s23, 4  ;;  %p1249_p8 = scmp.ne.s32.totalorder %s1471_s1, %s1248_s27  ;;  %s28_s24 = int_to_ptr.vmem [resolvable:$true] %s27_s24 }
  0x15   :  { %p1252_p9 = scmp.lt.u32.totalorder %s1248_s27, %s1471_s1 }
  0x17   :  { %p1254_p10 = pnand %p1252_p9, %p1249_p8 }
  0x19   :  { %1257 = shalt.err (!%p1254_p10)
}
  0x1a   :  { %s1258_s4 = scalar_lea.vmem %s28_s24, 768  ;;  %p1263_p12 = scmp.lt.s32.totalorder %s28_s24, %s28_s24 }
  0x1b   :  { %p1259_p11 = scmp.ne.s32.totalorder %s28_s24, %s1258_s4  ;;  %p1264_p13 = scmp.lt.s32.totalorder %s1258_s4, %s1258_s4 }
  0x1d   :  { %p1265_p0 = por %p1264_p13, %p1263_p12 }
  0x1f   :  { %p1266_p1 = pnand %p1265_p0, %p1259_p11 }
  0x21   :  { %1269 = shalt.err (!%p1266_p1)
}
  0x22   :  { %33 = dma.hbm_to_vmem [thread:$0]  %s1471_s1, 768, %s28_s24, [#allocation6], %s1299_s19, %s1299_s19, %s1300_s20  }
  0x23   :  { %1292 = dma.done.wait [#allocation3], 768  }
  0x24   :  { %1293 = vsyncadd [#allocation3], 4294966528 }
  0x25   :  { %1294 = dma.done.wait [#allocation6], 768  }
  0x26   :  { %1295 = vsyncadd [#allocation6], 4294966528  ;;  %v1302_v0 = vmov 0.0   ;;  %vm1303_vm0 = vmmov 0   ;;  %vm42_vm1 = vcmask 64512   ;;  %v40_v1 = vld [vmem:[#allocation2] sm:$0xff]  ;;  %v122_v6 = vlaneseq }
  0x27   :  { %1057 = vmatprep.subr.mxu0 %v1302_v0  ;;  %1059 = vmatprep.mubr.msk.f32.mxu0 %vm1303_vm0, %v1302_v0  ;;  %v41_v2 = vld [vmem:[#allocation5] sm:$0xff]  ;;  %v1304_v3 = vmov 0.0|0.0   ;;  %v1305_v4 = vmov 1966171168   ;;  %v116_v23 = vld [vmem:[#allocation2 + $0x8] sm:$0xff]  ;;  %v216_v47 = vld [vmem:[#allocation5 + $0x8] sm:$0xff] }
  0x28   :  { %1078 = vmatprep.mubr.msk.f32.mxu1 %vm1303_vm0, %v1302_v0  ;;  %1058 = vmatpush3.msra.mxu0 %v40_v1  ;;  %v120_v5 = vunpack.c.l.s4 %v1305_v4  ;;  %v123_v8 = vshrl.u32 %v122_v6, 7  ;;  %vm217_vm2 = vcmask 523264   ;;  %v291_v59 = vld [vmem:[#allocation2 + $0x10] sm:$0xff]  ;;  %s1306_s1 = smov [#allocation7]  }
  0x29   :  { %1060 = vmatmul.mubr.msk.f32.vlgmr.msra.gmra.mrb[0].mxu0 %vm42_vm1, %v41_v2  ;;  %1157 = vmatprep.subr.bf16.mxu1 %v1304_v3  ;;  %s994_s6 = sshll.u32 %s1306_s1, 4  ;;  %s995_s6 = int_to_ptr.vmem [resolvable:$true] %s994_s6 }
  0x2a   :  { %1097 = vmatprep.mubr.msk.f32.mxu0 %vm1303_vm0, %v1302_v0  ;;  %1169 = vmatprep.subr.bf16.mxu0 %v1304_v3  ;;  %v121_v7 = vunpack.c.0.s8 %v120_v5  ;;  %v1358_v14 = vsub.s32 0, %v123_v8  ;;  %s1270_s7 = scalar_lea.vmem %s995_s6, 128  ;;  %p1275_p3 = scmp.lt.s32.totalorder %s995_s6, %s995_s6 }
  0x2b   :  { %p1271_p2 = scmp.ne.s32.totalorder %s995_s6, %s1270_s7  ;;  %p1276_p4 = scmp.lt.s32.totalorder %s1270_s7, %s1270_s7 }
  0x2c   :  { %v1355_v9 = vsub.s32 %v121_v7, %v123_v8 }
  0x2d   :  { %p1277_p5 = por %p1276_p4, %p1275_p3 }
  0x2f   :  { %p1278_p6 = pnand %p1277_p5, %p1271_p2 }
  0xfc   :  { %v112_v10 = vpop.f32.mrb[0].mxu0 }
  0xfd   :  { %v118_v11 = vcombine.high %v112_v10, %v112_v10  ;;  %v125_v12 = vrot.slane %v112_v10, %v1355_v9  ;;  %v1061_v13 = vpop.f32.mrb[1].mxu0 }
  0xff   :  { %v132_v15 = vrot.slane %v118_v11, %v1355_v9  ;;  %v133_v16 = vcombine.high %v125_v12, %v125_v12  ;;  %v141_v17 = vrot.slane %v125_v12, %v1355_v9 }
 0x101   :  { %v134_v18 = vcombine.high %v132_v15, %v132_v15  ;;  %v155_v19 = vrot.slane %v133_v16, %v1355_v9  ;;  %v163_v20 = vcombine.high %v141_v17, %v141_v17  ;;  %v170_v21 = vrot.slane %v141_v17, %v1358_v14 }
 0x102   :  { %v148_v27 = vrot.slane %v132_v15, %v1355_v9 }
 0x103   :  { %v165_v22 = vcombine.high %v155_v19, %v155_v19  ;;  %v162_v24 = vrot.slane %v134_v18, %v1355_v9  ;;  %v174_v25 = vrot.slane %v155_v19, %v1358_v14  ;;  %v178_v28 = vrot.slane %v163_v20, %v1358_v14 }
 0x104   :  { %v207_v29 = vmul.f32 %v170_v21, %v116_v23  ;;  %v164_v35 = vcombine.high %v148_v27, %v148_v27  ;;  %v186_v36 = vrot.slane %v148_v27, %v1358_v14 }
 0x105   :  { %v182_v26 = vrot.slane %v165_v22, %v1358_v14  ;;  %v208_v30 = vmul.f32 %v174_v25, %v116_v23  ;;  %v166_v31 = vcombine.high %v162_v24, %v162_v24  ;;  %v190_v34 = vrot.slane %v162_v24, %v1358_v14  ;;  %v391_v24 = vld [vmem:[#allocation5 + $0x10] sm:$0xff] }
 0x106   :  { %v209_v37 = vmul.f32 %v178_v28, %v116_v23  ;;  %v211_v41 = vmul.f32 %v186_v36, %v116_v23  ;;  %v194_v42 = vrot.slane %v164_v35, %v1358_v14  ;;  %v465_v36 = vld [vmem:[#allocation2 + $0x18] sm:$0xff] }
 0x107   :  { %v1158_v32 = vpack.c.bf16 %v208_v30, %v207_v29  ;;  %v210_v33 = vmul.f32 %v182_v26, %v116_v23  ;;  %v212_v39 = vmul.f32 %v190_v34, %v116_v23  ;;  %v198_v40 = vrot.slane %v166_v31, %v1358_v14 }
 0x108   :  { %v213_v45 = vmul.f32 %v194_v42, %v116_v23 }
 0x109   :  { %1159 = vmatpush3.bf16.msra.mxu1 %v1158_v32  ;;  %v1161_v38 = vpack.c.bf16 %v210_v33, %v209_v37  ;;  %v1164_v43 = vpack.c.bf16 %v212_v39, %v211_v41  ;;  %v214_v44 = vmul.f32 %v198_v40, %v116_v23 }
 0x10a   :  { %1160 = vmatprep.subr.bf16.mxu1 %v1304_v3 }
 0x10b   :  { %v1167_v46 = vpack.c.bf16 %v214_v44, %v213_v45 }
 0x10d   :  { %1162 = vmatpush3.bf16.msra.mxu1 %v1161_v38 }
 0x10e   :  { %1163 = vmatprep.subr.bf16.mxu1 %v1304_v3 }
 0x111   :  { %1165 = vmatpush3.bf16.msra.mxu1 %v1164_v43 }
 0x112   :  { %1166 = vmatprep.subr.bf16.mxu1 %v1304_v3 }
 0x115   :  { %1168 = vmatpush3.bf16.msra.mxu1 %v1167_v46 }
 0x116   :  { %1181 = vmatprep.subr.bf16.mxu1 %v1304_v3 }
 0x118   :  { %1079 = vmatmul.mubr.msk.f32.vlgmr.msra.gmra.mrb[0].mxu1 %vm217_vm2, %v216_v47 }
 0x119   :  { %1116 = vmatprep.mubr.msk.f32.mxu1 %vm1303_vm0, %v1302_v0 }
 0x1eb   :  { %v287_v48 = vpop.f32.mrb[0].mxu1 }
 0x1ec   :  { %v293_v49 = vcombine.high %v287_v48, %v287_v48  ;;  %v300_v50 = vrot.slane %v287_v48, %v1355_v9  ;;  %v1080_v51 = vpop.f32.mrb[1].mxu1 }
 0x1ee   :  { %v307_v52 = vrot.slane %v293_v49, %v1355_v9  ;;  %v308_v53 = vcombine.high %v300_v50, %v300_v50  ;;  %v316_v54 = vrot.slane %v300_v50, %v1355_v9 }
 0x1f0   :  { %v309_v55 = vcombine.high %v307_v52, %v307_v52  ;;  %v330_v56 = vrot.slane %v308_v53, %v1355_v9  ;;  %v338_v57 = vcombine.high %v316_v54, %v316_v54  ;;  %v345_v58 = vrot.slane %v316_v54, %v1358_v14 }
 0x1f1   :  { %v323_v1 = vrot.slane %v307_v52, %v1355_v9 }
 0x1f2   :  { %v340_v60 = vcombine.high %v330_v56, %v330_v56  ;;  %v349_v61 = vrot.slane %v330_v56, %v1358_v14  ;;  %v337_v62 = vrot.slane %v309_v55, %v1355_v9  ;;  %v353_v2 = vrot.slane %v338_v57, %v1358_v14 }
 0x1f3   :  { %v382_v4 = vmul.f32 %v345_v58, %v291_v59  ;;  %v339_v11 = vcombine.high %v323_v1, %v323_v1  ;;  %v361_v12 = vrot.slane %v323_v1, %v1358_v14 }
 0x1f4   :  { %v357_v63 = vrot.slane %v340_v60, %v1358_v14  ;;  %v383_v5 = vmul.f32 %v349_v61, %v291_v59  ;;  %v341_v6 = vcombine.high %v337_v62, %v337_v62  ;;  %v365_v7 = vrot.slane %v337_v62, %v1358_v14  ;;  %v565_v61 = vld [vmem:[#allocation5 + $0x18] sm:$0xff] }
 0x1f5   :  { %v384_v13 = vmul.f32 %v353_v2, %v291_v59  ;;  %v369_v18 = vrot.slane %v339_v11, %v1358_v14  ;;  %v386_v19 = vmul.f32 %v361_v12, %v291_v59  ;;  %v639_v12 = vld [vmem:[#allocation2 + $0x20] sm:$0xff] }
 0x1f6   :  { %v1170_v8 = vpack.c.bf16 %v383_v5, %v382_v4  ;;  %v385_v10 = vmul.f32 %v357_v63, %v291_v59  ;;  %v387_v16 = vmul.f32 %v365_v7, %v291_v59  ;;  %v373_v17 = vrot.slane %v341_v6, %v1358_v14 }
 0x1f7   :  { %v388_v22 = vmul.f32 %v369_v18, %v291_v59 }
 0x1f8   :  { %1171 = vmatpush3.bf16.msra.mxu0 %v1170_v8  ;;  %v1173_v15 = vpack.c.bf16 %v385_v10, %v384_v13  ;;  %v1176_v20 = vpack.c.bf16 %v387_v16, %v386_v19  ;;  %v389_v21 = vmul.f32 %v373_v17, %v291_v59 }
 0x1f9   :  { %1172 = vmatprep.subr.bf16.mxu0 %v1304_v3 }
 0x1fa   :  { %v1179_v23 = vpack.c.bf16 %v389_v21, %v388_v22 }
 0x1fc   :  { %1174 = vmatpush3.bf16.msra.mxu0 %v1173_v15 }
 0x1fd   :  { %1175 = vmatprep.subr.bf16.mxu0 %v1304_v3 }
 0x200   :  { %1177 = vmatpush3.bf16.msra.mxu0 %v1176_v20 }
 0x201   :  { %1178 = vmatprep.subr.bf16.mxu0 %v1304_v3 }
 0x204   :  { %1180 = vmatpush3.bf16.msra.mxu0 %v1179_v23 }
 0x205   :  { %1193 = vmatprep.subr.bf16.mxu0 %v1304_v3 }
 0x207   :  { %1098 = vmatmul.mubr.msk.f32.vlgmr.msra.gmra.mrb[2].mxu0 %vm217_vm2, %v391_v24 }
 0x208   :  { %1135 = vmatprep.mubr.msk.f32.mxu0 %vm1303_vm0, %v1302_v0 }
 0x2da   :  { %v461_v25 = vpop.f32.mrb[2].mxu0 }
 0x2db   :  { %v467_v26 = vcombine.high %v461_v25, %v461_v25  ;;  %v474_v27 = vrot.slane %v461_v25, %v1355_v9  ;;  %v1099_v28 = vpop.f32.mrb[3].mxu0 }
 0x2dd   :  { %v481_v29 = vrot.slane %v467_v26, %v1355_v9  ;;  %v482_v30 = vcombine.high %v474_v27, %v474_v27  ;;  %v490_v31 = vrot.slane %v474_v27, %v1355_v9 }
 0x2df   :  { %v483_v32 = vcombine.high %v481_v29, %v481_v29  ;;  %v504_v33 = vrot.slane %v482_v30, %v1355_v9  ;;  %v512_v34 = vcombine.high %v490_v31, %v490_v31  ;;  %v519_v35 = vrot.slane %v490_v31, %v1358_v14 }
 0x2e0   :  { %v497_v41 = vrot.slane %v481_v29, %v1355_v9 }
 0x2e1   :  { %v514_v37 = vcombine.high %v504_v33, %v504_v33  ;;  %v523_v38 = vrot.slane %v504_v33, %v1358_v14  ;;  %v511_v39 = vrot.slane %v483_v32, %v1355_v9  ;;  %v527_v42 = vrot.slane %v512_v34, %v1358_v14 }
 0x2e2   :  { %v556_v43 = vmul.f32 %v519_v35, %v465_v36  ;;  %v513_v49 = vcombine.high %v497_v41, %v497_v41  ;;  %v535_v50 = vrot.slane %v497_v41, %v1358_v14 }
 0x2e3   :  { %v531_v40 = vrot.slane %v514_v37, %v1358_v14  ;;  %v557_v44 = vmul.f32 %v523_v38, %v465_v36  ;;  %v515_v45 = vcombine.high %v511_v39, %v511_v39  ;;  %v539_v46 = vrot.slane %v511_v39, %v1358_v14  ;;  %v739_v37 = vld [vmem:[#allocation5 + $0x20] sm:$0xff] }
 0x2e4   :  { %v558_v51 = vmul.f32 %v527_v42, %v465_v36  ;;  %v543_v55 = vrot.slane %v513_v49, %v1358_v14  ;;  %v560_v56 = vmul.f32 %v535_v50, %v465_v36  ;;  %v813_v49 = vld [vmem:[#allocation2 + $0x28] sm:$0xff] }
 0x2e5   :  { %v1182_v47 = vpack.c.bf16 %v557_v44, %v556_v43  ;;  %v559_v48 = vmul.f32 %v531_v40, %v465_v36  ;;  %v561_v53 = vmul.f32 %v539_v46, %v465_v36  ;;  %v547_v54 = vrot.slane %v515_v45, %v1358_v14 }
 0x2e6   :  { %v562_v59 = vmul.f32 %v543_v55, %v465_v36 }
 0x2e7   :  { %1183 = vmatpush3.bf16.msra.mxu1 %v1182_v47  ;;  %v1185_v52 = vpack.c.bf16 %v559_v48, %v558_v51  ;;  %v1188_v57 = vpack.c.bf16 %v561_v53, %v560_v56  ;;  %v563_v58 = vmul.f32 %v547_v54, %v465_v36 }
 0x2e8   :  { %1184 = vmatprep.subr.bf16.mxu1 %v1304_v3 }
 0x2e9   :  { %v1191_v60 = vpack.c.bf16 %v563_v58, %v562_v59 }
 0x2eb   :  { %1186 = vmatpush3.bf16.msra.mxu1 %v1185_v52 }
 0x2ec   :  { %1187 = vmatprep.subr.bf16.mxu1 %v1304_v3 }
 0x2ef   :  { %1189 = vmatpush3.bf16.msra.mxu1 %v1188_v57 }
 0x2f0   :  { %1190 = vmatprep.subr.bf16.mxu1 %v1304_v3 }
 0x2f3   :  { %1192 = vmatpush3.bf16.msra.mxu1 %v1191_v60 }
 0x2f4   :  { %1205 = vmatprep.subr.bf16.mxu1 %v1304_v3 }
 0x2f6   :  { %1117 = vmatmul.mubr.msk.f32.vlgmr.msra.gmra.mrb[2].mxu1 %vm217_vm2, %v565_v61 }
 0x2f7   :  { %1154 = vmatprep.mubr.msk.f32.mxu1 %vm1303_vm0, %v1302_v0 }
 0x3c9   :  { %v635_v62 = vpop.f32.mrb[2].mxu1 }
 0x3ca   :  { %v641_v63 = vcombine.high %v635_v62, %v635_v62  ;;  %v648_v1 = vrot.slane %v635_v62, %v1355_v9  ;;  %v1118_v2 = vpop.f32.mrb[3].mxu1 }
 0x3cc   :  { %v655_v4 = vrot.slane %v641_v63, %v1355_v9  ;;  %v656_v5 = vcombine.high %v648_v1, %v648_v1  ;;  %v664_v6 = vrot.slane %v648_v1, %v1355_v9 }
 0x3ce   :  { %v657_v7 = vcombine.high %v655_v4, %v655_v4  ;;  %v678_v8 = vrot.slane %v656_v5, %v1355_v9  ;;  %v686_v10 = vcombine.high %v664_v6, %v664_v6  ;;  %v693_v11 = vrot.slane %v664_v6, %v1358_v14 }
 0x3cf   :  { %v671_v17 = vrot.slane %v655_v4, %v1355_v9 }
 0x3d0   :  { %v688_v13 = vcombine.high %v678_v8, %v678_v8  ;;  %v697_v0 = vrot.slane %v678_v8, %v1358_v14  ;;  %v685_v15 = vrot.slane %v657_v7, %v1355_v9  ;;  %v701_v18 = vrot.slane %v686_v10, %v1358_v14 }
 0x3d1   :  { %v730_v19 = vmul.f32 %v693_v11, %v639_v12  ;;  %v687_v25 = vcombine.high %v671_v17, %v671_v17  ;;  %v709_v26 = vrot.slane %v671_v17, %v1358_v14 }
 0x3d2   :  { %v705_v16 = vrot.slane %v688_v13, %v1358_v14  ;;  %v731_v20 = vmul.f32 %v697_v0, %v639_v12  ;;  %v689_v21 = vcombine.high %v685_v15, %v685_v15  ;;  %v713_v22 = vrot.slane %v685_v15, %v1358_v14 }
 0x3d3   :  { %v732_v27 = vmul.f32 %v701_v18, %v639_v12  ;;  %v717_v31 = vrot.slane %v687_v25, %v1358_v14  ;;  %v734_v32 = vmul.f32 %v709_v26, %v639_v12 }
 0x3d4   :  { %v1194_v23 = vpack.c.bf16 %v731_v20, %v730_v19  ;;  %v733_v24 = vmul.f32 %v705_v16, %v639_v12  ;;  %v735_v29 = vmul.f32 %v713_v22, %v639_v12  ;;  %v721_v30 = vrot.slane %v689_v21, %v1358_v14 }
 0x3d5   :  { %v736_v35 = vmul.f32 %v717_v31, %v639_v12 }
 0x3d6   :  { %1195 = vmatpush3.bf16.msra.mxu0 %v1194_v23  ;;  %v1197_v28 = vpack.c.bf16 %v733_v24, %v732_v27  ;;  %v1200_v33 = vpack.c.bf16 %v735_v29, %v734_v32  ;;  %v737_v34 = vmul.f32 %v721_v30, %v639_v12  ;;  %v913_v12 = vld [vmem:[#allocation5 + $0x28] sm:$0xff] }
 0x3d7   :  { %1196 = vmatprep.subr.bf16.mxu0 %v1304_v3 }
 0x3d8   :  { %v1203_v36 = vpack.c.bf16 %v737_v34, %v736_v35 }
 0x3da   :  { %1198 = vmatpush3.bf16.msra.mxu0 %v1197_v28 }
 0x3db   :  { %1199 = vmatprep.subr.bf16.mxu0 %v1304_v3 }
 0x3de   :  { %1201 = vmatpush3.bf16.msra.mxu0 %v1200_v33 }
 0x3df   :  { %1202 = vmatprep.subr.bf16.mxu0 %v1304_v3 }
 0x3e2   :  { %1204 = vmatpush3.bf16.msra.mxu0 %v1203_v36 }
 0x3e5   :  { %1136 = vmatmul.mubr.msk.f32.vlgmr.msra.gmra.mrb[4].mxu0 %vm217_vm2, %v739_v37 }
 0x4b8   :  { %v809_v38 = vpop.f32.mrb[4].mxu0 }
 0x4b9   :  { %v815_v39 = vcombine.high %v809_v38, %v809_v38  ;;  %v822_v40 = vrot.slane %v809_v38, %v1355_v9  ;;  %v1137_v41 = vpop.f32.mrb[5].mxu0 }
 0x4bb   :  { %v829_v42 = vrot.slane %v815_v39, %v1355_v9  ;;  %v830_v43 = vcombine.high %v822_v40, %v822_v40  ;;  %v838_v44 = vrot.slane %v822_v40, %v1355_v9 }
 0x4bd   :  { %v831_v45 = vcombine.high %v829_v42, %v829_v42  ;;  %v852_v46 = vrot.slane %v830_v43, %v1355_v9  ;;  %v860_v47 = vcombine.high %v838_v44, %v838_v44  ;;  %v867_v48 = vrot.slane %v838_v44, %v1358_v14 }
 0x4be   :  { %v845_v54 = vrot.slane %v829_v42, %v1355_v9 }
 0x4bf   :  { %v862_v50 = vcombine.high %v852_v46, %v852_v46  ;;  %v871_v51 = vrot.slane %v852_v46, %v1358_v14  ;;  %v859_v52 = vrot.slane %v831_v45, %v1355_v9  ;;  %v875_v55 = vrot.slane %v860_v47, %v1358_v14 }
 0x4c0   :  { %v904_v56 = vmul.f32 %v867_v48, %v813_v49  ;;  %v861_v62 = vcombine.high %v845_v54, %v845_v54  ;;  %v883_v63 = vrot.slane %v845_v54, %v1358_v14 }
 0x4c1   :  { %v879_v53 = vrot.slane %v862_v50, %v1358_v14  ;;  %v905_v57 = vmul.f32 %v871_v51, %v813_v49  ;;  %v863_v58 = vcombine.high %v859_v52, %v859_v52  ;;  %v887_v59 = vrot.slane %v859_v52, %v1358_v14 }
 0x4c2   :  { %v906_v1 = vmul.f32 %v875_v55, %v813_v49  ;;  %v891_v5 = vrot.slane %v861_v62, %v1358_v14  ;;  %v908_v6 = vmul.f32 %v883_v63, %v813_v49 }
 0x4c3   :  { %v1206_v60 = vpack.c.bf16 %v905_v57, %v904_v56  ;;  %v907_v61 = vmul.f32 %v879_v53, %v813_v49  ;;  %v909_v4 = vmul.f32 %v887_v59, %v813_v49  ;;  %v895_v9 = vrot.slane %v863_v58, %v1358_v14 }
 0x4c4   :  { %v910_v10 = vmul.f32 %v891_v5, %v813_v49 }
 0x4c5   :  { %1207 = vmatpush3.bf16.msra.mxu1 %v1206_v60  ;;  %v1209_v2 = vpack.c.bf16 %v907_v61, %v906_v1  ;;  %v1212_v7 = vpack.c.bf16 %v909_v4, %v908_v6  ;;  %v911_v8 = vmul.f32 %v895_v9, %v813_v49 }
 0x4c6   :  { %1208 = vmatprep.subr.bf16.mxu1 %v1304_v3 }
 0x4c7   :  { %v1215_v11 = vpack.c.bf16 %v911_v8, %v910_v10 }
 0x4c9   :  { %1210 = vmatpush3.bf16.msra.mxu1 %v1209_v2 }
 0x4ca   :  { %1211 = vmatprep.subr.bf16.mxu1 %v1304_v3 }
 0x4cd   :  { %1213 = vmatpush3.bf16.msra.mxu1 %v1212_v7 }
 0x4ce   :  { %1214 = vmatprep.subr.bf16.mxu1 %v1304_v3 }
 0x4d1   :  { %1216 = vmatpush3.bf16.msra.mxu1 %v1215_v11 }
 0x4d4   :  { %1155 = vmatmul.mubr.msk.f32.vlgmr.msra.gmra.mrb[4].mxu1 %vm217_vm2, %v913_v12 }
 0x5a7   :  { %v983_v13 = vpop.f32.mrb[4].mxu1 }
 0x5a8   :  { %987 = vst [vmem:[#allocation7] sm:$0xff] %v983_v13  ;;  %v1156_v14 = vpop.f32.mrb[5].mxu1 }
 0x5a9   :  { %1281 = shalt.err (!%p1278_p6)
}
 0x5aa   :  { %s1282_s10 = scalar_lea.hbm %s1472_s2, 128 }
 0x5ab   :  { %p1283_p7 = scmp.ne.s32.totalorder %s1472_s2, %s1282_s10  ;;  %p1286_p8 = scmp.lt.u32.totalorder %s1282_s10, %s1472_s2 }
 0x5ad   :  { %p1288_p9 = pnand %p1286_p8, %p1283_p7 }
 0x5af   :  { %1291 = shalt.err (!%p1288_p9)
}
 0x5b0   :  { %997 = dma.vmem_to_hbm [thread:$0]  %s995_s6, 128, %s1472_s2, [#allocation4]  }
 0x5b1   :  { %1296 = dma.done.wait [#allocation4], 128  }
 0x5b2   :  { %1297 = vsyncadd [#allocation4], 4294967168 }
 0x5b3   :  { %1001 = vsyncpa [#allocation3], 1 }
 0x5b4   :  { %1002 = vsyncpa [#allocation6], 1 }
 0x5b5   :  { %1003 = vsyncpa [#allocation4], 1 }

</bundles_post_ra>
